<compile_context>
chip_gen: v7x
topology: tpu7x:2x2x1
jax: 0.10.0
libtpu: 0.0.40
codegen_flags: <defaults>
</compile_context>

<pallas_src>
import jax
import jax.numpy as jnp
from jax.experimental import pallas as pl
from jax.experimental.pallas import tpu as pltpu


def _round_up(x, m):
    return ((x + m - 1) // m) * m


def _mlp_kernel(z_ref, w1_ref, b1_ref, w2_ref, b2_ref, w3_ref, b3_ref, o_ref):
    # Layer 1: (tb, nz) @ (nz, H) + b1, ReLU.  f32 accumulation on the MXU.
    h1 = jnp.dot(z_ref[...], w1_ref[...], preferred_element_type=jnp.float32)
    h1 = jnp.maximum(h1 + b1_ref[...], 0.0)
    # Layer 2: (tb, H) @ (H, 2H) + b2, ReLU.
    h1 = h1.astype(w2_ref.dtype)        # no-op in f32 mode; bf16 cast in bf16 mode
    h2 = jnp.dot(h1, w2_ref[...], preferred_element_type=jnp.float32)
    h2 = jnp.maximum(h2 + b2_ref[...], 0.0)
    # Layer 3: (tb, 2H) @ (2H, out_dim) + b3, Tanh (EUP, f32).
    h2 = h2.astype(w3_ref.dtype)
    h3 = jnp.dot(h2, w3_ref[...], preferred_element_type=jnp.float32)
    # Unpadded (tb, out_dim) store: contiguous HBM writeback, no wasted lanes.
    o_ref[...] = jnp.tanh(h3 + b3_ref[...]).astype(o_ref.dtype)


def generator_corr_forward(z, params, n_assets, seq_length, *,
                           block_b=1024, use_bf16=False):
    """Run the GeneratorCorr MLP in a single fused Pallas kernel.

    z: (B, nz) float32
    params: dict with w1 (nz,H), b1 (1,H), w2 (H,2H), b2 (1,2H),
            w3 (2H, n_assets*seq_length), b3 (1, n_assets*seq_length)
    returns: (B, n_assets, seq_length) float32
    """
    B, nz = z.shape
    H = params["w1"].shape[1]
    H2 = params["w2"].shape[1]
    out_dim = n_assets * seq_length
    assert params["w3"].shape[1] == out_dim

    # ---- Batch tiling ----------------------------------------------------
    # Large tiles amortize per-grid-step overhead; >= 2 steps (when B allows)
    # keeps both v7x TensorCores busy; tb is a multiple of 8 sublanes and
    # B_p - B <= 7 * num_steps (tiny, bounded padding).
    num_steps = max(pl.cdiv(B, block_b), min(2, pl.cdiv(B, 8)))
    tb = _round_up(pl.cdiv(B, num_steps), 8)
    B_p = num_steps * tb
    z_p = jnp.pad(z, ((0, B_p - B), (0, 0))) if B_p != B else z

    # ---- Optional reduced-precision operands (v6e / v7x only) -------------
    # bf16 operands cut MXU passes and halve z/weight/output DMA; biases,
    # accumulation and tanh stay f32.  Keep the f32 default on v5e (no bf16
    # VPU/EUP support there).
    compute_dtype = jnp.bfloat16 if use_bf16 else jnp.float32
    out_dtype = compute_dtype
    z_in = z_p.astype(compute_dtype)
    w1 = params["w1"].astype(compute_dtype)
    w2 = params["w2"].astype(compute_dtype)
    w3 = params["w3"].astype(compute_dtype)
    b1, b2, b3 = params["b1"], params["b2"], params["b3"]

    # Weights/biases are VMEM-resident (constant block index across the grid).
    # They total only tens of KiB, so the default double-buffering overhead is
    # negligible at these sizes.
    def resident(a):
        return pl.BlockSpec(a.shape, lambda i: (0,) * a.ndim)

    itemsize = jnp.dtype(compute_dtype).itemsize
    flops = 2 * B_p * (nz * H + H * H2 + H2 * out_dim)
    bytes_accessed = (
        itemsize * (z_in.size + w1.size + w2.size + w3.size + B_p * out_dim)
        + 4 * (b1.size + b2.size + b3.size)
    )
    cost = pl.CostEstimate(flops=flops, transcendentals=B_p * out_dim,
                           bytes_accessed=bytes_accessed)

    out = pl.pallas_call(
        _mlp_kernel,
        out_shape=jax.ShapeDtypeStruct((B_p, out_dim), out_dtype),
        grid=(num_steps,),
        in_specs=[
            pl.BlockSpec((tb, nz), lambda i: (i, 0)),
            resident(w1), resident(b1),
            resident(w2), resident(b2),
            resident(w3), resident(b3),
        ],
        # (tb, out_dim) block: last dim equals the full array dim -> legal,
        # contiguous-in-HBM writeback with no padded lanes.
        out_specs=pl.BlockSpec((tb, out_dim), lambda i: (i, 0)),
        compiler_params=pltpu.CompilerParams(
            dimension_semantics=("parallel",),
        ),
        cost_estimate=cost,
    )(z_in, w1, b1, w2, b2, w3, b3)

    # Only a tiny row slice remains (<= 7*num_steps padded rows); the reshape
    # of the row-major (B, out_dim) result is a free bitcast.
    out = out[:B] if B_p != B else out
    return out.reshape(B, n_assets, seq_length).astype(z.dtype)


def init_params(key, nz, hidden_dim, n_assets, seq_length):
    """Deterministic init mimicking PyTorch nn.Linear default U(-1/sqrt(fan_in), ..)."""
    dims = [
        (nz, hidden_dim),
        (hidden_dim, hidden_dim * 2),
        (hidden_dim * 2, n_assets * seq_length),
    ]
    params = {}
    keys = jax.random.split(key, 2 * len(dims))
    for i, (fan_in, fan_out) in enumerate(dims):
        bound = 1.0 / (fan_in ** 0.5)
        w = jax.random.uniform(keys[2 * i], (fan_in, fan_out),
                               minval=-bound, maxval=bound, dtype=jnp.float32)
        b = jax.random.uniform(keys[2 * i + 1], (1, fan_out),
                               minval=-bound, maxval=bound, dtype=jnp.float32)
        params[f"w{i + 1}"] = w
        params[f"b{i + 1}"] = b
    return params


def reference_forward(z, params, n_assets, seq_length):
    h1 = jnp.maximum(z @ params["w1"] + params["b1"], 0.0)
    h2 = jnp.maximum(h1 @ params["w2"] + params["b2"], 0.0)
    out = jnp.tanh(h2 @ params["w3"] + params["b3"])
    return out.reshape(z.shape[0], n_assets, seq_length)


if __name__ == "__main__":
    # Small shapes consistent with the module's forward.
    batch = 2
    nz = 20
    hidden_dim = 32
    n_assets = 4
    seq_length = 8

    key = jax.random.PRNGKey(0)
    k_z, k_p, k_z2 = jax.random.split(key, 3)
    z = jax.random.normal(k_z, (batch, nz), dtype=jnp.float32)
    params = init_params(k_p, nz, hidden_dim, n_assets, seq_length)

    # Small-batch check (single grid step, a few padded rows).
    out = generator_corr_forward(z, params, n_assets, seq_length)
    out = jax.block_until_ready(out)
    ref = reference_forward(z, params, n_assets, seq_length)
    assert out.shape == (batch, n_assets, seq_length)
    assert jnp.allclose(out, ref, atol=1e-5, rtol=1e-5)

    # Larger, non-multiple batch exercises the multi-step grid (>=2 steps for
    # v7x megacore) and the pipelined z/out DMAs.
    big_batch = 300
    z_big = jax.random.normal(k_z2, (big_batch, nz), dtype=jnp.float32)
    out_big = generator_corr_forward(z_big, params, n_assets, seq_length)
    out_big = jax.block_until_ready(out_big)
    ref_big = reference_forward(z_big, params, n_assets, seq_length)
    assert out_big.shape == (big_batch, n_assets, seq_length)
    assert jnp.allclose(out_big, ref_big, atol=1e-5, rtol=1e-5)

    print("KERNEL_OK")
</pallas_src>

<mosaic_0001>
module attributes {stable_mosaic.version = 11 : i64} {
  func.func @_mlp_kernel(%arg0: i32, %arg1: memref<8x20xf32, #tpu.memory_space<vmem>>, %arg2: memref<20x32xf32, #tpu.memory_space<vmem>>, %arg3: memref<1x32xf32, #tpu.memory_space<vmem>>, %arg4: memref<32x64xf32, #tpu.memory_space<vmem>>, %arg5: memref<1x64xf32, #tpu.memory_space<vmem>>, %arg6: memref<64x32xf32, #tpu.memory_space<vmem>>, %arg7: memref<1x32xf32, #tpu.memory_space<vmem>>, %arg8: memref<8x32xf32, #tpu.memory_space<vmem>>) attributes {dimension_semantics = [#tpu.dimension_semantics<parallel>], iteration_bounds = array<i64: 1>, scalar_prefetch = 0 : i64, scratch_operands = 0 : i64, tpu.core_type = #tpu.core_type<tc>, window_params = [{transform_indices = @transform_0, window_bounds = array<i64: 8, 20>}, {pipeline_mode = #tpu.pipeline_mode<synchronous>, transform_indices = @transform_1, window_bounds = array<i64: 20, 32>}, {pipeline_mode = #tpu.pipeline_mode<synchronous>, transform_indices = @transform_2, window_bounds = array<i64: 1, 32>}, {pipeline_mode = #tpu.pipeline_mode<synchronous>, transform_indices = @transform_3, window_bounds = array<i64: 32, 64>}, {pipeline_mode = #tpu.pipeline_mode<synchronous>, transform_indices = @transform_4, window_bounds = array<i64: 1, 64>}, {pipeline_mode = #tpu.pipeline_mode<synchronous>, transform_indices = @transform_5, window_bounds = array<i64: 64, 32>}, {pipeline_mode = #tpu.pipeline_mode<synchronous>, transform_indices = @transform_6, window_bounds = array<i64: 1, 32>}, {transform_indices = @transform_7, window_bounds = array<i64: 8, 32>}]} {
    %c0 = arith.constant 0 : index
    %c0_0 = arith.constant 0 : index
    %0 = vector.load %arg1[%c0, %c0_0] : memref<8x20xf32, #tpu.memory_space<vmem>>, vector<8x20xf32>
    %c0_1 = arith.constant 0 : index
    %c0_2 = arith.constant 0 : index
    %1 = vector.load %arg2[%c0_1, %c0_2] : memref<20x32xf32, #tpu.memory_space<vmem>>, vector<20x32xf32>
    %cst = arith.constant dense<0.000000e+00> : vector<8x32xf32>
    %2 = tpu.matmul %0, %1, %cst {dimension_numbers = #tpu.dot_dimension_numbers<[1], [0], [0], [1], [0, 0, 1, 1], [], []>} : vector<8x20xf32>, vector<20x32xf32>, vector<8x32xf32> -> vector<8x32xf32>
    %c0_3 = arith.constant 0 : index
    %c0_4 = arith.constant 0 : index
    %3 = vector.load %arg3[%c0_3, %c0_4] : memref<1x32xf32, #tpu.memory_space<vmem>>, vector<1x32xf32>
    %4 = vector.broadcast %3 : vector<1x32xf32> to vector<8x32xf32>
    %5 = arith.addf %2, %4 : vector<8x32xf32>
    %cst_5 = arith.constant 0.000000e+00 : f32
    %6 = vector.broadcast %cst_5 : f32 to vector<8x32xf32>
    %7 = arith.maximumf %5, %6 : vector<8x32xf32>
    %c0_6 = arith.constant 0 : index
    %c0_7 = arith.constant 0 : index
    %8 = vector.load %arg4[%c0_6, %c0_7] : memref<32x64xf32, #tpu.memory_space<vmem>>, vector<32x64xf32>
    %cst_8 = arith.constant dense<0.000000e+00> : vector<8x64xf32>
    %9 = tpu.matmul %7, %8, %cst_8 {dimension_numbers = #tpu.dot_dimension_numbers<[1], [0], [0], [1], [0, 0, 1, 1], [], []>} : vector<8x32xf32>, vector<32x64xf32>, vector<8x64xf32> -> vector<8x64xf32>
    %c0_9 = arith.constant 0 : index
    %c0_10 = arith.constant 0 : index
    %10 = vector.load %arg5[%c0_9, %c0_10] : memref<1x64xf32, #tpu.memory_space<vmem>>, vector<1x64xf32>
    %11 = vector.broadcast %10 : vector<1x64xf32> to vector<8x64xf32>
    %12 = arith.addf %9, %11 : vector<8x64xf32>
    %cst_11 = arith.constant 0.000000e+00 : f32
    %13 = vector.broadcast %cst_11 : f32 to vector<8x64xf32>
    %14 = arith.maximumf %12, %13 : vector<8x64xf32>
    %c0_12 = arith.constant 0 : index
    %c0_13 = arith.constant 0 : index
    %15 = vector.load %arg6[%c0_12, %c0_13] : memref<64x32xf32, #tpu.memory_space<vmem>>, vector<64x32xf32>
    %cst_14 = arith.constant dense<0.000000e+00> : vector<8x32xf32>
    %16 = tpu.matmul %14, %15, %cst_14 {dimension_numbers = #tpu.dot_dimension_numbers<[1], [0], [0], [1], [0, 0, 1, 1], [], []>} : vector<8x64xf32>, vector<64x32xf32>, vector<8x32xf32> -> vector<8x32xf32>
    %c0_15 = arith.constant 0 : index
    %c0_16 = arith.constant 0 : index
    %17 = vector.load %arg7[%c0_15, %c0_16] : memref<1x32xf32, #tpu.memory_space<vmem>>, vector<1x32xf32>
    %18 = vector.broadcast %17 : vector<1x32xf32> to vector<8x32xf32>
    %19 = arith.addf %16, %18 : vector<8x32xf32>
    %20 = math.tanh %19 : vector<8x32xf32>
    %c0_17 = arith.constant 0 : index
    %c0_18 = arith.constant 0 : index
    %21 = vector.load %arg8[%c0_17, %c0_18] : memref<8x32xf32, #tpu.memory_space<vmem>>, vector<8x32xf32>
    tpu.vector_store %arg8[%c0_17, %c0_18], %20 {strides = array<i32>} : memref<8x32xf32, #tpu.memory_space<vmem>>, vector<8x32xf32>,
    return
  }
  func.func @transform_0(%arg0: i32) -> (i32, i32) {
    %c0_i32 = arith.constant 0 : i32
    %c0_i32_0 = arith.constant 0 : i32
    return %arg0, %c0_i32 : i32, i32
  }
  func.func @transform_1(%arg0: i32) -> (i32, i32) {
    %c0_i32 = arith.constant 0 : i32
    %c0_i32_0 = arith.constant 0 : i32
    %c0_i32_1 = arith.constant 0 : i32
    return %c0_i32, %c0_i32_0 : i32, i32
  }
  func.func @transform_2(%arg0: i32) -> (i32, i32) {
    %c0_i32 = arith.constant 0 : i32
    %c0_i32_0 = arith.constant 0 : i32
    %c0_i32_1 = arith.constant 0 : i32
    return %c0_i32, %c0_i32_0 : i32, i32
  }
  func.func @transform_3(%arg0: i32) -> (i32, i32) {
    %c0_i32 = arith.constant 0 : i32
    %c0_i32_0 = arith.constant 0 : i32
    %c0_i32_1 = arith.constant 0 : i32
    return %c0_i32, %c0_i32_0 : i32, i32
  }
  func.func @transform_4(%arg0: i32) -> (i32, i32) {
    %c0_i32 = arith.constant 0 : i32
    %c0_i32_0 = arith.constant 0 : i32
    %c0_i32_1 = arith.constant 0 : i32
    return %c0_i32, %c0_i32_0 : i32, i32
  }
  func.func @transform_5(%arg0: i32) -> (i32, i32) {
    %c0_i32 = arith.constant 0 : i32
    %c0_i32_0 = arith.constant 0 : i32
    %c0_i32_1 = arith.constant 0 : i32
    return %c0_i32, %c0_i32_0 : i32, i32
  }
  func.func @transform_6(%arg0: i32) -> (i32, i32) {
    %c0_i32 = arith.constant 0 : i32
    %c0_i32_0 = arith.constant 0 : i32
    %c0_i32_1 = arith.constant 0 : i32
    return %c0_i32, %c0_i32_0 : i32, i32
  }
  func.func @transform_7(%arg0: i32) -> (i32, i32) {
    %c0_i32 = arith.constant 0 : i32
    %c0_i32_0 = arith.constant 0 : i32
    return %arg0, %c0_i32 : i32, i32
  }
}

</mosaic_0001>

<bundles_post_ra>
// kernel: tpu_custom_call.1
= control target key start
LH: loop header
LB: loop body
LE: loop exit
PB: predicated region body
PF: predicated region fallthrough
CT: control target
= control target key end

     0   :  { %v423_v2 = vmov 0.0|0.0   ;;  %vm424_vm0 = vmmov 0   ;;  %v425_v4 = vmov 0.0   ;;  %s541_s0 = inlined_call_operand.vmem [shape: f32[8,20], index: 0, kind: input, shape index: {}]   ;;  %s542_s1 = inlined_call_operand.vmem [shape: f32[20,32], index: 1, kind: input, shape index: {}]   ;;  %s543_s2 = inlined_call_operand.vmem [shape: f32[1,32], index: 2, kind: input, shape index: {}]   ;;  %s544_s3 = inlined_call_operand.vmem [shape: f32[32,64], index: 3, kind: input, shape index: {}]   ;;  %s545_s4 = inlined_call_operand.vmem [shape: f32[1,64], index: 4, kind: input, shape index: {}]   ;;  %s546_s5 = inlined_call_operand.vmem [shape: f32[64,32], index: 5, kind: input, shape index: {}]   ;;  %s547_s6 = inlined_call_operand.vmem [shape: f32[1,32], index: 6, kind: input, shape index: {}]   ;;  %s548_s7 = inlined_call_operand.hbm [shape: f32[8,32], index: 7, kind: output, shape index: {}]  }
   0x1   :  { %v28_v0 = vld [vmem:[%s542_s1] sm:$0xff]  ;;  %v29_v1 = vld [vmem:[%s542_s1 + $0x8] sm:$0xff]  ;;  %372 = vmatprep.subr.bf16.mxu1 %v423_v2  ;;  %381 = vmatprep.subr.bf16.mxu0 %v423_v2 }
   0x2   :  { %v373_v3 = vpack.c.bf16 %v29_v1, %v28_v0  ;;  %339 = vmatprep.mubr.msk.f32.mxu1 %vm424_vm0, %v425_v4  ;;  %v117_v5 = vld [vmem:[%s544_s3] sm:$0xff]  ;;  %v118_v6 = vld [vmem:[%s544_s3 + $0x8] sm:$0xff]  ;;  %369 = vmatprep.mubr.msk.f32.mxu0 %vm424_vm0, %v425_v4 }
   0x3   :  { %12 = vsyncpa [#allocation3], 0  ;;  %v30_v7 = vld [vmem:[%s542_s1 + $0x10] sm:$0xf]  ;;  %vm42_vm1 = vcmask 1043456   ;;  %v27_v8 = vld [vmem:[%s541_s0] sm:$0xff]  ;;  %v376_v9 = vpack.c.bf16 %v118_v6, %v117_v5 }
   0x4   :  { %374 = vmatpush3.bf16.msra.mxu1 %v373_v3  ;;  %vm38_vm2 = vcmask 162816   ;;  %v119_v10 = vld [vmem:[%s544_s3 + $0x10] sm:$0xff]  ;;  %v120_v11 = vld [vmem:[%s544_s3 + $0x18] sm:$0xff]  ;;  %v203_v13 = vld [vmem:[%s546_s5] sm:$0xff]  ;;  %vm128_vm3 = vcmask 261120   ;;  %vm218_vm4 = vcmask 523264  }
   0x5   :  { %337 = vmatprep.subr.mxu1 %v425_v4  ;;  %v379_v12 = vpack.c.bf16 %v120_v11, %v119_v10  ;;  %v204_v14 = vld [vmem:[%s546_s5 + $0x8] sm:$0xff]  ;;  %v205_v15 = vld [vmem:[%s546_s5 + $0x10] sm:$0xff]  ;;  %v206_v17 = vld [vmem:[%s546_s5 + $0x18] sm:$0xff] }
   0x6   :  { %v382_v16 = vpack.c.bf16 %v204_v14, %v203_v13  ;;  %v385_v18 = vpack.c.bf16 %v206_v17, %v205_v15  ;;  %v207_v19 = vld [vmem:[%s546_s5 + $0x20] sm:$0xff]  ;;  %v208_v20 = vld [vmem:[%s546_s5 + $0x28] sm:$0xff]  ;;  %v209_v27 = vld [vmem:[%s546_s5 + $0x30] sm:$0xff] }
   0x7   :  { %v388_v21 = vpack.c.bf16 %v208_v20, %v207_v19  ;;  %v308_v22 = vld [vmem:[%s543_s2] ss:$0 sm:$0xff]  ;;  %v210_v28 = vld [vmem:[%s546_s5 + $0x38] sm:$0xff]  ;;  %s426_s5 = smov [#allocation2]  }
   0x8   :  { %338 = vmatpush3.msk.msra.mxu1 %vm42_vm1, %v30_v7  ;;  %383 = vmatpush3.bf16.msra.mxu0 %v382_v16  ;;  %v391_v29 = vpack.c.bf16 %v210_v28, %v209_v27  ;;  %v311_v30 = vld [vmem:[%s545_s4] ss:$0 sm:$0xff]  ;;  %s300_s12 = sshll.u32 %s426_s5, 4  ;;  %s301_s12 = int_to_ptr.vmem [resolvable:$true] %s300_s12 }
   0x9   :  { %340 = vmatmul.mubr.msk.f32.vlgmr.msra.gmra.mrb[0].mxu1 %vm38_vm2, %v27_v8  ;;  %375 = vmatprep.subr.bf16.mxu1 %v423_v2  ;;  %v313_v35 = vld [vmem:[%s547_s6] ss:$0 sm:$0xff]  ;;  %s399_s4 = scalar_lea.vmem %s301_s12, 128  ;;  %p404_p1 = scmp.lt.s32.totalorder %s301_s12, %s301_s12 }
   0xa   :  { %377 = vmatpush3.bf16.msra.mxu1 %v376_v9  ;;  %350 = vmatprep.mubr.msk.f32.mxu1 %vm424_vm0, %v425_v4  ;;  %p400_p0 = scmp.ne.s32.totalorder %s301_s12, %s399_s4  ;;  %p405_p2 = scmp.lt.s32.totalorder %s399_s4, %s399_s4 }
   0xb   :  { %378 = vmatprep.subr.bf16.mxu1 %v423_v2  ;;  %384 = vmatprep.subr.bf16.mxu0 %v423_v2 }
   0xc   :  { %386 = vmatpush3.bf16.msra.mxu0 %v385_v18  ;;  %p406_p3 = por %p405_p2, %p404_p1 }
   0xd   :  { %387 = vmatprep.subr.bf16.mxu0 %v423_v2 }
   0xe   :  { %380 = vmatpush3.bf16.msra.mxu1 %v379_v12  ;;  %p407_p4 = pnand %p406_p3, %p400_p0 }
  0x10   :  { %389 = vmatpush3.bf16.msra.mxu0 %v388_v21 }
  0x11   :  { %390 = vmatprep.subr.bf16.mxu0 %v423_v2 }
  0x14   :  { %392 = vmatpush3.bf16.msra.mxu0 %v391_v29 }
  0xdc   :  { %v112_v23 = vpop.f32.mrb[0].mxu1 }
  0xdd   :  { %v113_v24 = vadd.f32 %v308_v22, %v112_v23  ;;  %v341_v25 = vpop.f32.mrb[1].mxu1 }
  0xdf   :  { %v116_v26 = vmax.f32 %v113_v24, 0.0 }
  0xe1   :  { %351 = vmatmul.mubr.msk.f32.vlgmr.msra.gmra.mrb[2].mxu1 %vm128_vm3, %v116_v26 }
 0x1b4   :  { %v198_v31 = vpop.f32.mrb[2].mxu1 }
 0x1b5   :  { %v199_v32 = vadd.f32 %v311_v30, %v198_v31  ;;  %v352_v33 = vpop.f32.mrb[3].mxu1 }
 0x1b7   :  { %v202_v34 = vmax.f32 %v199_v32, 0.0 }
 0x1b9   :  { %370 = vmatmul.mubr.msk.f32.vlgmr.msra.gmra.mrb[0].mxu0 %vm218_vm4, %v202_v34 }
 0x28c   :  { %v288_v36 = vpop.f32.mrb[0].mxu0 }
 0x28d   :  { %v289_v37 = vadd.f32 %v313_v35, %v288_v36  ;;  %v371_v38 = vpop.f32.mrb[1].mxu0 }
 0x28f   :  { %397 = vtanh.f32 %v289_v37 }
 0x299   :  { %v398_v39 = vpop.eup %397 }
 0x29a   :  { %293 = vst.msk [vmem:[#allocation2] sm:$0xff] %vm128_vm3, %v398_v39 }
 0x29b   :  { %410 = shalt.err (!%p407_p4)
}
 0x29c   :  { %s411_s6 = scalar_lea.hbm %s548_s7, 128 }
 0x29d   :  { %p412_p5 = scmp.ne.s32.totalorder %s548_s7, %s411_s6  ;;  %p415_p6 = scmp.lt.u32.totalorder %s411_s6, %s548_s7 }
 0x29f   :  { %p417_p7 = pnand %p415_p6, %p412_p5 }
 0x2a1   :  { %420 = shalt.err (!%p417_p7)
}
 0x2a2   :  { %303 = dma.vmem_to_hbm [thread:$0]  %s301_s12, 128, %s548_s7, [#allocation3]  }
 0x2a3   :  { %421 = dma.done.wait [#allocation3], 128  }
 0x2a4   :  { %422 = vsyncadd [#allocation3], 4294967168 }
 0x2a5   :  { %307 = vsyncpa [#allocation3], 1 }

</bundles_post_ra>
